<compile_context>
chip_gen: v6e
topology: v6e:2x2x1
jax: 0.10.0
libtpu: 0.0.40
codegen_flags: <defaults>
</compile_context>

<pallas_src>
import functools

import jax
import jax.numpy as jnp
from jax.experimental import pallas as pl
from jax.experimental.pallas import tpu as pltpu


def _round_up(x, m):
    return ((x + m - 1) // m) * m


def _sigmoid_eup(a):
    # sigmoid via exp (EUP) + approx reciprocal (EUP); keeps divide off VALU.
    return pl.reciprocal(1.0 + jnp.exp(-a), approx=True)


def rial_kernel(obs_ref, aid_ref, msg_ref, h_ref,
                w1o_ref, w1a_ref, w1m_ref, w2_ref, wih_ref, whh_ref,
                wc_ref, wq_ref,
                bias_h_ref, bias_g_ref, bq_ref,
                q_ref, hout_ref):
    H_pad = w2_ref.shape[0]      # hidden_dim padded to 128
    Hr_pad = whh_ref.shape[0]    # hidden_dim//2 padded to 128 (per-gate stride)

    obs = obs_ref[...].astype(jnp.bfloat16)
    aid = aid_ref[...].astype(jnp.bfloat16)
    msg = msg_ref[...].astype(jnp.bfloat16)
    h = h_ref[...]                               # (bt, Hr_pad) f32, padded lanes = 0
    hb = h.astype(jnp.bfloat16)

    b1 = bias_h_ref[0:1, :]
    b2 = bias_h_ref[1:2, :]
    bc = bias_h_ref[2:3, :]
    b_ih = bias_g_ref[0:1, :]                    # (1, 3*Hr_pad) [r | z | n]
    b_hh = bias_g_ref[1:2, :]

    # fc1 + ReLU as a split matmul over the (un-concatenated) input segments.
    a1 = (jnp.dot(obs, w1o_ref[...], preferred_element_type=jnp.float32)
          + jnp.dot(aid, w1a_ref[...], preferred_element_type=jnp.float32)
          + jnp.dot(msg, w1m_ref[...], preferred_element_type=jnp.float32)
          + b1)
    a1 = jnp.maximum(a1, 0.0)

    # fc2 + ReLU
    fc_out = jnp.dot(a1.astype(jnp.bfloat16), w2_ref[...],
                     preferred_element_type=jnp.float32) + b2
    fc_out = jnp.maximum(fc_out, 0.0)
    fcb = fc_out.astype(jnp.bfloat16)

    # Single-step GRU, fused gate matmuls, 128-aligned gate slices (r, z, n).
    gx = jnp.dot(fcb, wih_ref[...], preferred_element_type=jnp.float32) + b_ih
    gh = jnp.dot(hb, whh_ref[...], preferred_element_type=jnp.float32) + b_hh

    r = _sigmoid_eup(gx[:, 0:Hr_pad] + gh[:, 0:Hr_pad])
    z = _sigmoid_eup(gx[:, Hr_pad:2 * Hr_pad] + gh[:, Hr_pad:2 * Hr_pad])
    n = jnp.tanh(gx[:, 2 * Hr_pad:3 * Hr_pad] + r * gh[:, 2 * Hr_pad:3 * Hr_pad])
    h_new = (1.0 - z) * n + z * h                # (bt, Hr_pad) == rnn_out == h_out[0]

    # fc_combine(concat([fc_out, rnn_out], -1)) + ReLU as a split matmul against
    # 128-aligned sublane slices of one (H_pad + Hr_pad, H_pad) weight slab.
    comb = (jnp.dot(fcb, wc_ref[0:H_pad, :], preferred_element_type=jnp.float32)
            + jnp.dot(h_new.astype(jnp.bfloat16), wc_ref[H_pad:H_pad + Hr_pad, :],
                      preferred_element_type=jnp.float32)
            + bc)
    final = jnp.maximum(comb, 0.0).astype(jnp.bfloat16)

    # q_head: lane-dense (A_pad-wide, zero-padded) output slab.
    q_ref[...] = (jnp.dot(final, wq_ref[...], preferred_element_type=jnp.float32)
                  + bq_ref[...])
    # Lane-dense hidden-state store (full vregs, no masked vst).
    hout_ref[...] = h_new


def init_params(key, input_dim, message_dim, agent_id_dim, hidden_dim, action_dim):
    """Deterministic parameter init mirroring the PyTorch module's __init__."""
    total_in = input_dim + message_dim + agent_id_dim
    hr = hidden_dim // 2
    H_pad = _round_up(hidden_dim, 128)
    Hr_pad = _round_up(hr, 128)
    A_pad = _round_up(action_dim, 128)

    keys = jax.random.split(key, 8)

    def kaiming(k, fan_in, shape):
        # kaiming_normal_(mode='fan_in', nonlinearity='relu') -> std = sqrt(2/fan_in)
        std = (2.0 / fan_in) ** 0.5
        return std * jax.random.normal(k, shape, jnp.float32)

    def pad2(w, rows, cols):
        out = jnp.zeros((rows, cols), jnp.float32)
        return out.at[:w.shape[0], :w.shape[1]].set(w)

    # fc1 split by input segment (row-slices of one kaiming matrix, fan_in=total_in).
    w1 = kaiming(keys[0], total_in, (total_in, hidden_dim))
    w1o = pad2(w1[0:input_dim], input_dim, H_pad)
    w1a = pad2(w1[input_dim:input_dim + agent_id_dim], agent_id_dim, H_pad)
    w1m = pad2(w1[input_dim + agent_id_dim:], message_dim, H_pad)

    w2 = pad2(kaiming(keys[1], hidden_dim, (hidden_dim, hidden_dim)), H_pad, H_pad)
    wq = pad2(kaiming(keys[3], hidden_dim, (hidden_dim, action_dim)), H_pad, A_pad)

    # fc_combine: rows [0:H] multiply fc_out, rows [H_pad:H_pad+hr] multiply rnn_out.
    wc_raw = kaiming(keys[2], hidden_dim + hr, (hidden_dim + hr, hidden_dim))
    wc = jnp.zeros((H_pad + Hr_pad, H_pad), jnp.float32)
    wc = wc.at[0:hidden_dim, 0:hidden_dim].set(wc_raw[0:hidden_dim])
    wc = wc.at[H_pad:H_pad + hr, 0:hidden_dim].set(wc_raw[hidden_dim:])

    # GRU params: PyTorch default U(+-1/sqrt(hr)), gate order (r, z, n),
    # each gate padded to a 128-lane-aligned Hr_pad stride.
    bound = 1.0 / (hr ** 0.5)

    def uni(k, shape):
        return jax.random.uniform(k, shape, jnp.float32, -bound, bound)

    wih_raw = uni(keys[4], (hidden_dim, 3 * hr))
    whh_raw = uni(keys[5], (hr, 3 * hr))
    bih_raw = uni(keys[6], (3 * hr,))
    bhh_raw = uni(keys[7], (3 * hr,))

    def pad_gates_w(w, in_dim, in_pad):
        out = jnp.zeros((in_pad, 3 * Hr_pad), jnp.float32)
        for g in range(3):
            out = out.at[0:in_dim, g * Hr_pad:g * Hr_pad + hr].set(
                w[:, g * hr:(g + 1) * hr])
        return out

    def pad_gates_b(b):
        out = jnp.zeros((3 * Hr_pad,), jnp.float32)
        for g in range(3):
            out = out.at[g * Hr_pad:g * Hr_pad + hr].set(b[g * hr:(g + 1) * hr])
        return out

    return {
        # bf16 weight slabs (MXU operands)
        "w1o": w1o.astype(jnp.bfloat16),
        "w1a": w1a.astype(jnp.bfloat16),
        "w1m": w1m.astype(jnp.bfloat16),
        "w2": w2.astype(jnp.bfloat16),
        "wih": pad_gates_w(wih_raw, hidden_dim, H_pad).astype(jnp.bfloat16),
        "whh": pad_gates_w(whh_raw, hr, Hr_pad).astype(jnp.bfloat16),
        "wc": wc.astype(jnp.bfloat16),
        "wq": wq.astype(jnp.bfloat16),
        # f32 bias slabs (added post-accumulation); Linear biases are zero per
        # the module's _init_weights (constant_(bias, 0)), GRU biases uniform.
        "bias_h": jnp.zeros((3, H_pad), jnp.float32),          # [b1; b2; bc]
        "bias_g": jnp.stack([pad_gates_b(bih_raw), pad_gates_b(bhh_raw)], 0),
        "bq": jnp.zeros((1, A_pad), jnp.float32),
    }


@functools.partial(jax.jit, static_argnames=("action_dim", "batch_block"))
def rial_forward(params, obs_input, agent_id_input, message_input, hidden,
                 *, action_dim, batch_block=512):
    """Matches ImprovedRIALNet.forward: returns (q_values, h_out)."""
    obs = obs_input.astype(jnp.float32)
    aid = agent_id_input.astype(jnp.float32)
    msg = message_input.astype(jnp.float32)
    h0 = hidden[0].astype(jnp.float32)               # (1, B, Hr) -> (B, Hr)

    B = obs.shape[0]
    D_obs, D_id, D_msg = obs.shape[1], aid.shape[1], msg.shape[1]
    Hr = h0.shape[1]
    H_pad = params["w2"].shape[0]
    Hr_pad = params["whh"].shape[0]
    A_pad = params["wq"].shape[1]
    G_pad = 3 * Hr_pad

    # Batch tile: sublane multiple, and >=2 grid steps for large B so v7x's
    # second TensorCore gets work under dimension_semantics=("parallel",).
    bt = max(8, min(batch_block, _round_up(-(-B // 2), 8)))
    B_pad = _round_up(B, bt)
    grid = (B_pad // bt,)

    pad_b = lambda a: jnp.pad(a, ((0, B_pad - B), (0, 0)))
    obs_p, aid_p, msg_p = pad_b(obs), pad_b(aid), pad_b(msg)
    h0_p = jnp.pad(h0, ((0, B_pad - B), (0, Hr_pad - Hr)))   # lane-dense, padded lanes 0

    def row(width):
        return pl.BlockSpec((bt, width), lambda i: (i, 0))

    def const(shape):
        # Grid-invariant block index -> weights/biases stay VMEM-resident.
        # TODO(synk): try pipeline_mode=pl.Buffered(1) to halve their VMEM
        # footprint once verified against the target jax/Mosaic version.
        return pl.BlockSpec(shape, lambda i: (0, 0))

    args = [obs_p, aid_p, msg_p, h0_p,
            params["w1o"], params["w1a"], params["w1m"], params["w2"],
            params["wih"], params["whh"], params["wc"], params["wq"],
            params["bias_h"], params["bias_g"], params["bq"]]

    in_specs = ([row(D_obs), row(D_id), row(D_msg), row(Hr_pad)]
                + [const(a.shape) for a in args[4:]])

    # Advisory cost estimate so XLA can overlap the custom call with the glue ops.
    flops = 2 * B_pad * ((D_obs + D_id + D_msg) * H_pad + H_pad * H_pad
                         + H_pad * G_pad + Hr_pad * G_pad
                         + (H_pad + Hr_pad) * H_pad + H_pad * A_pad)
    transcendentals = 5 * B_pad * Hr_pad                      # 2*(exp+recip) + tanh
    w_bytes = sum(int(p.size) * p.dtype.itemsize for p in args[4:])
    io_bytes = 4 * B_pad * (D_obs + D_id + D_msg + 2 * Hr_pad + A_pad)
    cost = pl.CostEstimate(flops=flops, transcendentals=transcendentals,
                           bytes_accessed=io_bytes + w_bytes)

    # Explicit scoped-VMEM budget: double-buffered tile IO + resident weights +
    # live f32/bf16 intermediates, 2x headroom, capped under v7x's 64 MiB.
    tile_io = 4 * bt * (D_obs + D_id + D_msg + 2 * Hr_pad + A_pad)
    inter = bt * (4 * (2 * H_pad + 2 * G_pad + 4 * Hr_pad + H_pad + A_pad)
                  + 2 * (3 * H_pad + Hr_pad))
    vmem_limit = int(min(max(2 * (2 * (tile_io + w_bytes) + inter),
                             32 * 1024 * 1024), 60 * 1024 * 1024))

    q_pad, h_new = pl.pallas_call(
        rial_kernel,
        grid=grid,
        out_shape=(jax.ShapeDtypeStruct((B_pad, A_pad), jnp.float32),
                   jax.ShapeDtypeStruct((B_pad, Hr_pad), jnp.float32)),
        in_specs=in_specs,
        out_specs=(row(A_pad), row(Hr_pad)),
        input_output_aliases={3: 1},              # padded h0 buffer reused for h_out
        compiler_params=pltpu.CompilerParams(
            dimension_semantics=("parallel",),
            vmem_limit_bytes=vmem_limit),
        cost_estimate=cost,
    )(*args)

    q_values = q_pad[:B, :action_dim]             # drop batch + lane padding
    h_out = h_new[:B, :Hr][None, :, :]            # (1, B, Hr) like PyTorch GRU
    return q_values, h_out


if __name__ == "__main__":
    # Small shapes consistent with the module's forward.
    input_dim, message_dim, agent_id_dim = 16, 8, 4
    hidden_dim, action_dim = 32, 5
    batch = 2
    h_rnn = hidden_dim // 2

    params = init_params(jax.random.PRNGKey(0),
                         input_dim, message_dim, agent_id_dim,
                         hidden_dim, action_dim)

    dkey = jax.random.PRNGKey(0)
    k_obs, k_id, k_msg, k_h = jax.random.split(dkey, 4)
    obs = jax.random.normal(k_obs, (batch, input_dim), jnp.float32)
    agent_id = jax.random.normal(k_id, (batch, agent_id_dim), jnp.float32)
    message = jax.random.normal(k_msg, (batch, message_dim), jnp.float32)
    hidden = jax.random.normal(k_h, (1, batch, h_rnn), jnp.float32)

    q_values, h_out = rial_forward(params, obs, agent_id, message, hidden,
                                   action_dim=action_dim)
    jax.block_until_ready((q_values, h_out))

    assert q_values.shape == (batch, action_dim)
    assert h_out.shape == (1, batch, h_rnn)
    assert bool(jnp.all(jnp.isfinite(q_values)))
    assert bool(jnp.all(jnp.isfinite(h_out)))

    # Pure-JAX f32 reference (same padded params, real sub-blocks) for parity.
    def ref_forward():
        f = lambda a: jnp.asarray(a, jnp.float32)
        H, Hr, Hp, Hrp = hidden_dim, h_rnn, params["w2"].shape[0], params["whh"].shape[0]
        a1 = jnp.maximum(obs @ f(params["w1o"])[:, :H]
                         + agent_id @ f(params["w1a"])[:, :H]
                         + message @ f(params["w1m"])[:, :H], 0.0)
        fc = jnp.maximum(a1 @ f(params["w2"])[:H, :H], 0.0)
        wih, whh, bg = f(params["wih"]), f(params["whh"]), params["bias_g"]
        h0f = hidden[0]
        gx = [fc @ wih[:H, g * Hrp:g * Hrp + Hr] + bg[0, g * Hrp:g * Hrp + Hr]
              for g in range(3)]
        gh = [h0f @ whh[:Hr, g * Hrp:g * Hrp + Hr] + bg[1, g * Hrp:g * Hrp + Hr]
              for g in range(3)]
        r = jax.nn.sigmoid(gx[0] + gh[0])
        z = jax.nn.sigmoid(gx[1] + gh[1])
        n = jnp.tanh(gx[2] + r * gh[2])
        hn = (1.0 - z) * n + z * h0f
        wc = f(params["wc"])
        comb = jnp.maximum(fc @ wc[:H, :H] + hn @ wc[Hp:Hp + Hr, :H], 0.0)
        return comb @ f(params["wq"])[:H, :action_dim], hn

    q_ref, h_ref_v = ref_forward()
    assert bool(jnp.allclose(q_values, q_ref, atol=1e-1, rtol=1e-1))
    assert bool(jnp.allclose(h_out[0], h_ref_v, atol=1e-1, rtol=1e-1))

    print("KERNEL_OK")
</pallas_src>

<mosaic_0001>
module attributes {stable_mosaic.version = 11 : i64} {
  func.func @rial_kernel(%arg0: i32, %arg1: memref<8x16xf32, #tpu.memory_space<vmem>>, %arg2: memref<8x4xf32, #tpu.memory_space<vmem>>, %arg3: memref<8x8xf32, #tpu.memory_space<vmem>>, %arg4: memref<8x128xf32, #tpu.memory_space<vmem>>, %arg5: memref<16x128xbf16, #tpu.memory_space<vmem>>, %arg6: memref<4x128xbf16, #tpu.memory_space<vmem>>, %arg7: memref<8x128xbf16, #tpu.memory_space<vmem>>, %arg8: memref<128x128xbf16, #tpu.memory_space<vmem>>, %arg9: memref<128x384xbf16, #tpu.memory_space<vmem>>, %arg10: memref<128x384xbf16, #tpu.memory_space<vmem>>, %arg11: memref<256x128xbf16, #tpu.memory_space<vmem>>, %arg12: memref<128x128xbf16, #tpu.memory_space<vmem>>, %arg13: memref<3x128xf32, #tpu.memory_space<vmem>>, %arg14: memref<2x384xf32, #tpu.memory_space<vmem>>, %arg15: memref<1x128xf32, #tpu.memory_space<vmem>>, %arg16: memref<8x128xf32, #tpu.memory_space<vmem>>, %arg17: memref<8x128xf32, #tpu.memory_space<vmem>>) attributes {dimension_semantics = [#tpu.dimension_semantics<parallel>], iteration_bounds = array<i64: 1>, scalar_prefetch = 0 : i64, scratch_operands = 0 : i64, tpu.core_type = #tpu.core_type<tc>, window_params = [{transform_indices = @transform_0, window_bounds = array<i64: 8, 16>}, {transform_indices = @transform_1, window_bounds = array<i64: 8, 4>}, {transform_indices = @transform_2, window_bounds = array<i64: 8, 8>}, {transform_indices = @transform_3, window_bounds = array<i64: 8, 128>}, {pipeline_mode = #tpu.pipeline_mode<synchronous>, transform_indices = @transform_4, window_bounds = array<i64: 16, 128>}, {pipeline_mode = #tpu.pipeline_mode<synchronous>, transform_indices = @transform_5, window_bounds = array<i64: 4, 128>}, {pipeline_mode = #tpu.pipeline_mode<synchronous>, transform_indices = @transform_6, window_bounds = array<i64: 8, 128>}, {pipeline_mode = #tpu.pipeline_mode<synchronous>, transform_indices = @transform_7, window_bounds = array<i64: 128, 128>}, {pipeline_mode = #tpu.pipeline_mode<synchronous>, transform_indices = @transform_8, window_bounds = array<i64: 128, 384>}, {pipeline_mode = #tpu.pipeline_mode<synchronous>, transform_indices = @transform_9, window_bounds = array<i64: 128, 384>}, {pipeline_mode = #tpu.pipeline_mode<synchronous>, transform_indices = @transform_10, window_bounds = array<i64: 256, 128>}, {pipeline_mode = #tpu.pipeline_mode<synchronous>, transform_indices = @transform_11, window_bounds = array<i64: 128, 128>}, {pipeline_mode = #tpu.pipeline_mode<synchronous>, transform_indices = @transform_12, window_bounds = array<i64: 3, 128>}, {pipeline_mode = #tpu.pipeline_mode<synchronous>, transform_indices = @transform_13, window_bounds = array<i64: 2, 384>}, {pipeline_mode = #tpu.pipeline_mode<synchronous>, transform_indices = @transform_14, window_bounds = array<i64: 1, 128>}, {transform_indices = @transform_15, window_bounds = array<i64: 8, 128>}, {transform_indices = @transform_16, window_bounds = array<i64: 8, 128>}]} {
    %c0 = arith.constant 0 : index
    %c0_0 = arith.constant 0 : index
    %0 = vector.load %arg1[%c0, %c0_0] : memref<8x16xf32, #tpu.memory_space<vmem>>, vector<8x16xf32>
    %1 = arith.truncf %0 : vector<8x16xf32> to vector<8x16xbf16>
    %c0_1 = arith.constant 0 : index
    %c0_2 = arith.constant 0 : index
    %2 = vector.load %arg2[%c0_1, %c0_2] : memref<8x4xf32, #tpu.memory_space<vmem>>, vector<8x4xf32>
    %3 = arith.truncf %2 : vector<8x4xf32> to vector<8x4xbf16>
    %c0_3 = arith.constant 0 : index
    %c0_4 = arith.constant 0 : index
    %4 = vector.load %arg3[%c0_3, %c0_4] : memref<8x8xf32, #tpu.memory_space<vmem>>, vector<8x8xf32>
    %5 = arith.truncf %4 : vector<8x8xf32> to vector<8x8xbf16>
    %c0_5 = arith.constant 0 : index
    %c0_6 = arith.constant 0 : index
    %6 = vector.load %arg4[%c0_5, %c0_6] : memref<8x128xf32, #tpu.memory_space<vmem>>, vector<8x128xf32>
    %7 = arith.truncf %6 : vector<8x128xf32> to vector<8x128xbf16>
    %c0_7 = arith.constant 0 : index
    %c0_8 = arith.constant 0 : index
    %8 = vector.load %arg13[%c0_7, %c0_8] : memref<3x128xf32, #tpu.memory_space<vmem>>, vector<1x128xf32>
    %c1 = arith.constant 1 : index
    %c0_9 = arith.constant 0 : index
    %9 = vector.load %arg13[%c1, %c0_9] : memref<3x128xf32, #tpu.memory_space<vmem>>, vector<1x128xf32>
    %c2 = arith.constant 2 : index
    %c0_10 = arith.constant 0 : index
    %10 = vector.load %arg13[%c2, %c0_10] : memref<3x128xf32, #tpu.memory_space<vmem>>, vector<1x128xf32>
    %c0_11 = arith.constant 0 : index
    %c0_12 = arith.constant 0 : index
    %11 = vector.load %arg14[%c0_11, %c0_12] : memref<2x384xf32, #tpu.memory_space<vmem>>, vector<1x384xf32>
    %c1_13 = arith.constant 1 : index
    %c0_14 = arith.constant 0 : index
    %12 = vector.load %arg14[%c1_13, %c0_14] : memref<2x384xf32, #tpu.memory_space<vmem>>, vector<1x384xf32>
    %c0_15 = arith.constant 0 : index
    %c0_16 = arith.constant 0 : index
    %13 = vector.load %arg5[%c0_15, %c0_16] : memref<16x128xbf16, #tpu.memory_space<vmem>>, vector<16x128xbf16>
    %cst = arith.constant dense<0.000000e+00> : vector<8x128xf32>
    %14 = tpu.matmul %1, %13, %cst {dimension_numbers = #tpu.dot_dimension_numbers<[1], [0], [0], [1], [0, 0, 1, 1], [], []>} : vector<8x16xbf16>, vector<16x128xbf16>, vector<8x128xf32> -> vector<8x128xf32>
    %c0_17 = arith.constant 0 : index
    %c0_18 = arith.constant 0 : index
    %15 = vector.load %arg6[%c0_17, %c0_18] : memref<4x128xbf16, #tpu.memory_space<vmem>>, vector<4x128xbf16>
    %cst_19 = arith.constant dense<0.000000e+00> : vector<8x128xf32>
    %16 = tpu.matmul %3, %15, %cst_19 {dimension_numbers = #tpu.dot_dimension_numbers<[1], [0], [0], [1], [0, 0, 1, 1], [], []>} : vector<8x4xbf16>, vector<4x128xbf16>, vector<8x128xf32> -> vector<8x128xf32>
    %17 = arith.addf %14, %16 : vector<8x128xf32>
    %c0_20 = arith.constant 0 : index
    %c0_21 = arith.constant 0 : index
    %18 = vector.load %arg7[%c0_20, %c0_21] : memref<8x128xbf16, #tpu.memory_space<vmem>>, vector<8x128xbf16>
    %cst_22 = arith.constant dense<0.000000e+00> : vector<8x128xf32>
    %19 = tpu.matmul %5, %18, %cst_22 {dimension_numbers = #tpu.dot_dimension_numbers<[1], [0], [0], [1], [0, 0, 1, 1], [], []>} : vector<8x8xbf16>, vector<8x128xbf16>, vector<8x128xf32> -> vector<8x128xf32>
    %20 = arith.addf %17, %19 : vector<8x128xf32>
    %21 = vector.broadcast %8 : vector<1x128xf32> to vector<8x128xf32>
    %22 = arith.addf %20, %21 : vector<8x128xf32>
    %cst_23 = arith.constant 0.000000e+00 : f32
    %23 = vector.broadcast %cst_23 : f32 to vector<8x128xf32>
    %24 = arith.maximumf %22, %23 : vector<8x128xf32>
    %25 = arith.truncf %24 : vector<8x128xf32> to vector<8x128xbf16>
    %c0_24 = arith.constant 0 : index
    %c0_25 = arith.constant 0 : index
    %26 = vector.load %arg8[%c0_24, %c0_25] : memref<128x128xbf16, #tpu.memory_space<vmem>>, vector<128x128xbf16>
    %cst_26 = arith.constant dense<0.000000e+00> : vector<8x128xf32>
    %27 = tpu.matmul %25, %26, %cst_26 {dimension_numbers = #tpu.dot_dimension_numbers<[1], [0], [0], [1], [0, 0, 1, 1], [], []>} : vector<8x128xbf16>, vector<128x128xbf16>, vector<8x128xf32> -> vector<8x128xf32>
    %28 = vector.broadcast %9 : vector<1x128xf32> to vector<8x128xf32>
    %29 = arith.addf %27, %28 : vector<8x128xf32>
    %cst_27 = arith.constant 0.000000e+00 : f32
    %30 = vector.broadcast %cst_27 : f32 to vector<8x128xf32>
    %31 = arith.maximumf %29, %30 : vector<8x128xf32>
    %32 = arith.truncf %31 : vector<8x128xf32> to vector<8x128xbf16>
    %c0_28 = arith.constant 0 : index
    %c0_29 = arith.constant 0 : index
    %33 = vector.load %arg9[%c0_28, %c0_29] : memref<128x384xbf16, #tpu.memory_space<vmem>>, vector<128x384xbf16>
    %cst_30 = arith.constant dense<0.000000e+00> : vector<8x384xf32>
    %34 = tpu.matmul %32, %33, %cst_30 {dimension_numbers = #tpu.dot_dimension_numbers<[1], [0], [0], [1], [0, 0, 1, 1], [], []>} : vector<8x128xbf16>, vector<128x384xbf16>, vector<8x384xf32> -> vector<8x384xf32>
    %35 = vector.broadcast %11 : vector<1x384xf32> to vector<8x384xf32>
    %36 = arith.addf %34, %35 : vector<8x384xf32>
    %c0_31 = arith.constant 0 : index
    %c0_32 = arith.constant 0 : index
    %37 = vector.load %arg10[%c0_31, %c0_32] : memref<128x384xbf16, #tpu.memory_space<vmem>>, vector<128x384xbf16>
    %cst_33 = arith.constant dense<0.000000e+00> : vector<8x384xf32>
    %38 = tpu.matmul %7, %37, %cst_33 {dimension_numbers = #tpu.dot_dimension_numbers<[1], [0], [0], [1], [0, 0, 1, 1], [], []>} : vector<8x128xbf16>, vector<128x384xbf16>, vector<8x384xf32> -> vector<8x384xf32>
    %39 = vector.broadcast %12 : vector<1x384xf32> to vector<8x384xf32>
    %40 = arith.addf %38, %39 : vector<8x384xf32>
    %41 = vector.extract_strided_slice %36 {offsets = [0, 0], sizes = [8, 128], strides = [1, 1]} : vector<8x384xf32> to vector<8x128xf32>
    %42 = vector.extract_strided_slice %40 {offsets = [0, 0], sizes = [8, 128], strides = [1, 1]} : vector<8x384xf32> to vector<8x128xf32>
    %43 = arith.addf %41, %42 : vector<8x128xf32>
    %cst_34 = arith.constant 0.000000e+00 : f32
    %44 = vector.broadcast %cst_34 : f32 to vector<8x128xf32>
    %45 = arith.subf %44, %43 : vector<8x128xf32>
    %46 = math.exp %45 : vector<8x128xf32>
    %cst_35 = arith.constant 1.000000e+00 : f32
    %47 = vector.broadcast %cst_35 : f32 to vector<8x128xf32>
    %48 = arith.addf %47, %46 : vector<8x128xf32>
    %49 = tpu.reciprocal %48 {approx = true} : vector<8x128xf32> -> vector<8x128xf32>
    %50 = vector.extract_strided_slice %36 {offsets = [0, 128], sizes = [8, 128], strides = [1, 1]} : vector<8x384xf32> to vector<8x128xf32>
    %51 = vector.extract_strided_slice %40 {offsets = [0, 128], sizes = [8, 128], strides = [1, 1]} : vector<8x384xf32> to vector<8x128xf32>
    %52 = arith.addf %50, %51 : vector<8x128xf32>
    %cst_36 = arith.constant 0.000000e+00 : f32
    %53 = vector.broadcast %cst_36 : f32 to vector<8x128xf32>
    %54 = arith.subf %53, %52 : vector<8x128xf32>
    %55 = math.exp %54 : vector<8x128xf32>
    %cst_37 = arith.constant 1.000000e+00 : f32
    %56 = vector.broadcast %cst_37 : f32 to vector<8x128xf32>
    %57 = arith.addf %56, %55 : vector<8x128xf32>
    %58 = tpu.reciprocal %57 {approx = true} : vector<8x128xf32> -> vector<8x128xf32>
    %59 = vector.extract_strided_slice %36 {offsets = [0, 256], sizes = [8, 128], strides = [1, 1]} : vector<8x384xf32> to vector<8x128xf32>
    %60 = vector.extract_strided_slice %40 {offsets = [0, 256], sizes = [8, 128], strides = [1, 1]} : vector<8x384xf32> to vector<8x128xf32>
    %61 = arith.mulf %49, %60 : vector<8x128xf32>
    %62 = arith.addf %59, %61 : vector<8x128xf32>
    %63 = math.tanh %62 : vector<8x128xf32>
    %cst_38 = arith.constant 1.000000e+00 : f32
    %64 = vector.broadcast %cst_38 : f32 to vector<8x128xf32>
    %65 = arith.subf %64, %58 : vector<8x128xf32>
    %66 = arith.mulf %65, %63 : vector<8x128xf32>
    %67 = arith.mulf %58, %6 : vector<8x128xf32>
    %68 = arith.addf %66, %67 : vector<8x128xf32>
    %c0_39 = arith.constant 0 : index
    %c0_40 = arith.constant 0 : index
    %69 = vector.load %arg11[%c0_39, %c0_40] : memref<256x128xbf16, #tpu.memory_space<vmem>>, vector<128x128xbf16>
    %cst_41 = arith.constant dense<0.000000e+00> : vector<8x128xf32>
    %70 = tpu.matmul %32, %69, %cst_41 {dimension_numbers = #tpu.dot_dimension_numbers<[1], [0], [0], [1], [0, 0, 1, 1], [], []>} : vector<8x128xbf16>, vector<128x128xbf16>, vector<8x128xf32> -> vector<8x128xf32>
    %71 = arith.truncf %68 : vector<8x128xf32> to vector<8x128xbf16>
    %c128 = arith.constant 128 : index
    %c0_42 = arith.constant 0 : index
    %72 = vector.load %arg11[%c128, %c0_42] : memref<256x128xbf16, #tpu.memory_space<vmem>>, vector<128x128xbf16>
    %cst_43 = arith.constant dense<0.000000e+00> : vector<8x128xf32>
    %73 = tpu.matmul %71, %72, %cst_43 {dimension_numbers = #tpu.dot_dimension_numbers<[1], [0], [0], [1], [0, 0, 1, 1], [], []>} : vector<8x128xbf16>, vector<128x128xbf16>, vector<8x128xf32> -> vector<8x128xf32>
    %74 = arith.addf %70, %73 : vector<8x128xf32>
    %75 = vector.broadcast %10 : vector<1x128xf32> to vector<8x128xf32>
    %76 = arith.addf %74, %75 : vector<8x128xf32>
    %cst_44 = arith.constant 0.000000e+00 : f32
    %77 = vector.broadcast %cst_44 : f32 to vector<8x128xf32>
    %78 = arith.maximumf %76, %77 : vector<8x128xf32>
    %79 = arith.truncf %78 : vector<8x128xf32> to vector<8x128xbf16>
    %c0_45 = arith.constant 0 : index
    %c0_46 = arith.constant 0 : index
    %80 = vector.load %arg12[%c0_45, %c0_46] : memref<128x128xbf16, #tpu.memory_space<vmem>>, vector<128x128xbf16>
    %cst_47 = arith.constant dense<0.000000e+00> : vector<8x128xf32>
    %81 = tpu.matmul %79, %80, %cst_47 {dimension_numbers = #tpu.dot_dimension_numbers<[1], [0], [0], [1], [0, 0, 1, 1], [], []>} : vector<8x128xbf16>, vector<128x128xbf16>, vector<8x128xf32> -> vector<8x128xf32>
    %c0_48 = arith.constant 0 : index
    %c0_49 = arith.constant 0 : index
    %82 = vector.load %arg15[%c0_48, %c0_49] : memref<1x128xf32, #tpu.memory_space<vmem>>, vector<1x128xf32>
    %83 = vector.broadcast %82 : vector<1x128xf32> to vector<8x128xf32>
    %84 = arith.addf %81, %83 : vector<8x128xf32>
    %c0_50 = arith.constant 0 : index
    %c0_51 = arith.constant 0 : index
    %85 = vector.load %arg16[%c0_50, %c0_51] : memref<8x128xf32, #tpu.memory_space<vmem>>, vector<8x128xf32>
    tpu.vector_store %arg16[%c0_50, %c0_51], %84 {strides = array<i32>} : memref<8x128xf32, #tpu.memory_space<vmem>>, vector<8x128xf32>,
    %c0_52 = arith.constant 0 : index
    %c0_53 = arith.constant 0 : index
    %86 = vector.load %arg17[%c0_52, %c0_53] : memref<8x128xf32, #tpu.memory_space<vmem>>, vector<8x128xf32>
    tpu.vector_store %arg17[%c0_52, %c0_53], %68 {strides = array<i32>} : memref<8x128xf32, #tpu.memory_space<vmem>>, vector<8x128xf32>,
    return
  }
  func.func @transform_0(%arg0: i32) -> (i32, i32) {
    %c0_i32 = arith.constant 0 : i32
    %c0_i32_0 = arith.constant 0 : i32
    return %arg0, %c0_i32 : i32, i32
  }
  func.func @transform_1(%arg0: i32) -> (i32, i32) {
    %c0_i32 = arith.constant 0 : i32
    %c0_i32_0 = arith.constant 0 : i32
    return %arg0, %c0_i32 : i32, i32
  }
  func.func @transform_2(%arg0: i32) -> (i32, i32) {
    %c0_i32 = arith.constant 0 : i32
    %c0_i32_0 = arith.constant 0 : i32
    return %arg0, %c0_i32 : i32, i32
  }
  func.func @transform_3(%arg0: i32) -> (i32, i32) {
    %c0_i32 = arith.constant 0 : i32
    %c0_i32_0 = arith.constant 0 : i32
    return %arg0, %c0_i32 : i32, i32
  }
  func.func @transform_4(%arg0: i32) -> (i32, i32) {
    %c0_i32 = arith.constant 0 : i32
    %c0_i32_0 = arith.constant 0 : i32
    %c0_i32_1 = arith.constant 0 : i32
    return %c0_i32, %c0_i32_0 : i32, i32
  }
  func.func @transform_5(%arg0: i32) -> (i32, i32) {
    %c0_i32 = arith.constant 0 : i32
    %c0_i32_0 = arith.constant 0 : i32
    %c0_i32_1 = arith.constant 0 : i32
    return %c0_i32, %c0_i32_0 : i32, i32
  }
  func.func @transform_6(%arg0: i32) -> (i32, i32) {
    %c0_i32 = arith.constant 0 : i32
    %c0_i32_0 = arith.constant 0 : i32
    %c0_i32_1 = arith.constant 0 : i32
    return %c0_i32, %c0_i32_0 : i32, i32
  }
  func.func @transform_7(%arg0: i32) -> (i32, i32) {
    %c0_i32 = arith.constant 0 : i32
    %c0_i32_0 = arith.constant 0 : i32
    %c0_i32_1 = arith.constant 0 : i32
    return %c0_i32, %c0_i32_0 : i32, i32
  }
  func.func @transform_8(%arg0: i32) -> (i32, i32) {
    %c0_i32 = arith.constant 0 : i32
    %c0_i32_0 = arith.constant 0 : i32
    %c0_i32_1 = arith.constant 0 : i32
    return %c0_i32, %c0_i32_0 : i32, i32
  }
  func.func @transform_9(%arg0: i32) -> (i32, i32) {
    %c0_i32 = arith.constant 0 : i32
    %c0_i32_0 = arith.constant 0 : i32
    %c0_i32_1 = arith.constant 0 : i32
    return %c0_i32, %c0_i32_0 : i32, i32
  }
  func.func @transform_10(%arg0: i32) -> (i32, i32) {
    %c0_i32 = arith.constant 0 : i32
    %c0_i32_0 = arith.constant 0 : i32
    %c0_i32_1 = arith.constant 0 : i32
    return %c0_i32, %c0_i32_0 : i32, i32
  }
  func.func @transform_11(%arg0: i32) -> (i32, i32) {
    %c0_i32 = arith.constant 0 : i32
    %c0_i32_0 = arith.constant 0 : i32
    %c0_i32_1 = arith.constant 0 : i32
    return %c0_i32, %c0_i32_0 : i32, i32
  }
  func.func @transform_12(%arg0: i32) -> (i32, i32) {
    %c0_i32 = arith.constant 0 : i32
    %c0_i32_0 = arith.constant 0 : i32
    %c0_i32_1 = arith.constant 0 : i32
    return %c0_i32, %c0_i32_0 : i32, i32
  }
  func.func @transform_13(%arg0: i32) -> (i32, i32) {
    %c0_i32 = arith.constant 0 : i32
    %c0_i32_0 = arith.constant 0 : i32
    %c0_i32_1 = arith.constant 0 : i32
    return %c0_i32, %c0_i32_0 : i32, i32
  }
  func.func @transform_14(%arg0: i32) -> (i32, i32) {
    %c0_i32 = arith.constant 0 : i32
    %c0_i32_0 = arith.constant 0 : i32
    %c0_i32_1 = arith.constant 0 : i32
    return %c0_i32, %c0_i32_0 : i32, i32
  }
  func.func @transform_15(%arg0: i32) -> (i32, i32) {
    %c0_i32 = arith.constant 0 : i32
    %c0_i32_0 = arith.constant 0 : i32
    return %arg0, %c0_i32 : i32, i32
  }
  func.func @transform_16(%arg0: i32) -> (i32, i32) {
    %c0_i32 = arith.constant 0 : i32
    %c0_i32_0 = arith.constant 0 : i32
    return %arg0, %c0_i32 : i32, i32
  }
}

</mosaic_0001>

<bundles_post_ra>
// kernel: rial_forward.1
= control target key start
LH: loop header
LB: loop body
LE: loop exit
PB: predicated region body
PF: predicated region fallthrough
CT: control target
= control target key end

     0   :  { %s2227_s0 = inlined_call_operand.vmem [shape: f32[8,16], index: 0, kind: input, shape index: {}]   ;;  %s2228_s1 = inlined_call_operand.vmem [shape: f32[8,4], index: 1, kind: input, shape index: {}]   ;;  %s2229_s2 = inlined_call_operand.vmem [shape: f32[8,8], index: 2, kind: input, shape index: {}]   ;;  %s2230_s3 = inlined_call_operand.vmem [shape: f32[8,128], index: 3, kind: input, shape index: {}, may-alias: {3,16}]   ;;  %s2231_s4 = inlined_call_operand.hbm [shape: bf16[16,128], index: 4, kind: input, shape index: {}]   ;;  %s2232_s5 = inlined_call_operand.hbm [shape: bf16[4,128], index: 5, kind: input, shape index: {}]   ;;  %s2233_s6 = inlined_call_operand.hbm [shape: bf16[8,128], index: 6, kind: input, shape index: {}]   ;;  %s2234_s7 = inlined_call_operand.hbm [shape: bf16[128,128], index: 7, kind: input, shape index: {}]   ;;  %s2235_s8 = inlined_call_operand.hbm [shape: bf16[128,384], index: 8, kind: input, shape index: {}]   ;;  %s2236_s9 = inlined_call_operand.hbm [shape: bf16[128,384], index: 9, kind: input, shape index: {}]   ;;  %s2237_s10 = inlined_call_operand.hbm [shape: bf16[256,128], index: 10, kind: input, shape index: {}]   ;;  %s2238_s11 = inlined_call_operand.vmem [shape: bf16[128,128], index: 11, kind: input, shape index: {}]   ;;  %s2239_s12 = inlined_call_operand.hbm [shape: f32[3,128], index: 12, kind: input, shape index: {}]   ;;  %s2240_s13 = inlined_call_operand.hbm [shape: f32[2,384], index: 13, kind: input, shape index: {}]   ;;  %s2241_s14 = inlined_call_operand.hbm [shape: f32[1,128], index: 14, kind: input, shape index: {}]   ;;  %s2242_s15 = inlined_call_operand.vmem [shape: f32[8,128], index: 15, kind: output, shape index: {0}]   ;;  %s2243_s16 = inlined_call_operand.vmem [shape: f32[8,128], index: 16, kind: output, shape index: {1}, may-alias: {3,16}]  }
   0x1   :  { %2244 = sst [smem:[#allocation24_spill]] %s2227_s0 }
   0x2   :  { %22 = vsyncpa [#allocation3], 0 }
   0x3   :  { %23 = vsyncpa [#allocation5], 0 }
   0x4   :  { %24 = vsyncpa [#allocation8], 0 }
   0x5   :  { %25 = vsyncpa [#allocation11], 0 }
   0x6   :  { %26 = vsyncpa [#allocation14], 0 }
   0x7   :  { %27 = vsyncpa [#allocation17], 0  ;;  %s1959_s21 = smov [#allocation4]  }
   0x8   :  { %s54_s22 = sshll.u32 %s1959_s21, 4  ;;  %s55_s22 = int_to_ptr.vmem [resolvable:$true] %s54_s22 }
   0x9   :  { %s1755_s23 = scalar_lea.vmem %s55_s22, 32  ;;  %p1760_p1 = scmp.lt.s32.totalorder %s55_s22, %s55_s22 }
   0xa   :  { %p1756_p0 = scmp.ne.s32.totalorder %s55_s22, %s1755_s23  ;;  %p1761_p2 = scmp.lt.s32.totalorder %s1755_s23, %s1755_s23 }
   0xc   :  { %p1762_p3 = por %p1761_p2, %p1760_p1 }
   0xe   :  { %p1763_p4 = pnand %p1762_p3, %p1756_p0 }
  0x10   :  { %1766 = shalt.err (!%p1763_p4)
}
  0x11   :  { %57 = dma.hbm_to_vmem [thread:$0]  %s2232_s5, 32, %s55_s22, [#allocation5]  }
  0x12   :  { %s1960_s26 = smov [#allocation7]  }
  0x13   :  { %s73_s27 = sshll.u32 %s1960_s26, 4  ;;  %s74_s27 = int_to_ptr.vmem [resolvable:$true] %s73_s27 }
  0x14   :  { %s1775_s28 = scalar_lea.vmem %s74_s27, 1024  ;;  %p1780_p6 = scmp.lt.s32.totalorder %s74_s27, %s74_s27 }
  0x15   :  { %p1776_p5 = scmp.ne.s32.totalorder %s74_s27, %s1775_s28  ;;  %p1781_p7 = scmp.lt.s32.totalorder %s1775_s28, %s1775_s28 }
  0x17   :  { %p1782_p8 = por %p1781_p7, %p1780_p6 }
  0x19   :  { %p1783_p9 = pnand %p1782_p8, %p1776_p5 }
  0x1b   :  { %1786 = shalt.err (!%p1783_p9)
}
  0x1c   :  { %s1961_s29 = smov 64   ;;  %s1962_s30 = smov 4  }
  0x1d   :  { %79 = dma.hbm_to_vmem [thread:$0]  %s2234_s7, 1024, %s74_s27, [#allocation8], %s1961_s29, %s1961_s29, %s1962_s30  }
  0x1e   :  { %s1963_s5 = smov [#allocation10]   ;;  %s1964_s19 = smov [#allocation13]  }
  0x1f   :  { %s97_s18 = sshll.u32 %s1963_s5, 4  ;;  %s124_s20 = sshll.u32 %s1964_s19, 4  ;;  %s98_s18 = int_to_ptr.vmem [resolvable:$true] %s97_s18  ;;  %s125_s20 = int_to_ptr.vmem [resolvable:$true] %s124_s20 }
  0x20   :  { %s1795_s21 = scalar_lea.vmem %s98_s18, 3072  ;;  %p1800_p11 = scmp.lt.s32.totalorder %s98_s18, %s98_s18 }
  0x21   :  { %p1796_p10 = scmp.ne.s32.totalorder %s98_s18, %s1795_s21  ;;  %p1801_p12 = scmp.lt.s32.totalorder %s1795_s21, %s1795_s21 }
  0x23   :  { %p1802_p13 = por %p1801_p12, %p1800_p11 }
  0x25   :  { %p1803_p0 = pnand %p1802_p13, %p1796_p10 }
  0x27   :  { %1806 = shalt.err (!%p1803_p0)
}
  0x28   :  { %s1965_s22 = smov 192   ;;  %s1966_s23 = smov 12  }
  0x29   :  { %103 = dma.hbm_to_vmem [thread:$0]  %s2236_s9, 3072, %s98_s18, [#allocation11], %s1965_s22, %s1965_s22, %s1966_s23  }
  0x2a   :  { %s1815_s25 = scalar_lea.vmem %s125_s20, 64  ;;  %p1820_p2 = scmp.lt.s32.totalorder %s125_s20, %s125_s20 }
  0x2b   :  { %p1816_p1 = scmp.ne.s32.totalorder %s125_s20, %s1815_s25  ;;  %p1821_p3 = scmp.lt.s32.totalorder %s1815_s25, %s1815_s25 }
  0x2d   :  { %p1822_p4 = por %p1821_p3, %p1820_p2 }
  0x2f   :  { %p1823_p5 = pnand %p1822_p4, %p1816_p1 }
  0x31   :  { %1826 = shalt.err (!%p1823_p5)
}
  0x32   :  { %127 = dma.hbm_to_vmem [thread:$0]  %s2239_s12, 64, %s125_s20, [#allocation14]  }
  0x33   :  { %s1967_s28 = smov [#allocation2]   ;;  %s1968_s17 = smov [#allocation6]  }
  0x34   :  { %s41_s0 = sshll.u32 %s1967_s28, 4  ;;  %s64_s5 = sshll.u32 %s1968_s17, 4  ;;  %s42_s0 = int_to_ptr.vmem [resolvable:$true] %s41_s0  ;;  %s65_s5 = int_to_ptr.vmem [resolvable:$true] %s64_s5 }
  0x35   :  { %s1835_s19 = scalar_lea.vmem %s42_s0, 128  ;;  %p1840_p7 = scmp.lt.s32.totalorder %s42_s0, %s42_s0 }
  0x36   :  { %p1836_p6 = scmp.ne.s32.totalorder %s42_s0, %s1835_s19  ;;  %p1841_p8 = scmp.lt.s32.totalorder %s1835_s19, %s1835_s19 }
  0x38   :  { %p1842_p9 = por %p1841_p8, %p1840_p7 }
  0x3a   :  { %p1843_p10 = pnand %p1842_p9, %p1836_p6 }
  0x3c   :  { %1846 = shalt.err (!%p1843_p10)
}
  0x3d   :  { %47 = dma.hbm_to_vmem [thread:$0]  %s2231_s4, 128, %s42_s0, [#allocation3], %s1961_s29, %s1961_s29, %s1962_s30  }
  0x3e   :  { %s1855_s12 = scalar_lea.vmem %s65_s5, 64  ;;  %p1860_p12 = scmp.lt.s32.totalorder %s65_s5, %s65_s5 }
  0x3f   :  { %p1856_p11 = scmp.ne.s32.totalorder %s65_s5, %s1855_s12  ;;  %p1861_p13 = scmp.lt.s32.totalorder %s1855_s12, %s1855_s12 }
  0x41   :  { %p1862_p0 = por %p1861_p13, %p1860_p12 }
  0x43   :  { %p1863_p1 = pnand %p1862_p0, %p1856_p11 }
  0x45   :  { %1866 = shalt.err (!%p1863_p1)
}
  0x46   :  { %67 = dma.hbm_to_vmem [thread:$0]  %s2233_s6, 64, %s65_s5, [#allocation5]  }
  0x47   :  { %s1969_s24 = smov [#allocation9]   ;;  %s1970_s25 = smov [#allocation12]  }
  0x48   :  { %s85_s7 = sshll.u32 %s1969_s24, 4  ;;  %s109_s26 = sshll.u32 %s1970_s25, 4  ;;  %s86_s7 = int_to_ptr.vmem [resolvable:$true] %s85_s7  ;;  %s110_s26 = int_to_ptr.vmem [resolvable:$true] %s109_s26 }
  0x49   :  { %s1875_s27 = scalar_lea.vmem %s86_s7, 3072  ;;  %p1880_p3 = scmp.lt.s32.totalorder %s86_s7, %s86_s7 }
  0x4a   :  { %p1876_p2 = scmp.ne.s32.totalorder %s86_s7, %s1875_s27  ;;  %p1881_p4 = scmp.lt.s32.totalorder %s1875_s27, %s1875_s27 }
  0x4c   :  { %p1882_p5 = por %p1881_p4, %p1880_p3 }
  0x4e   :  { %p1883_p6 = pnand %p1882_p5, %p1876_p2 }
  0x50   :  { %1886 = shalt.err (!%p1883_p6)
}
  0x51   :  { %91 = dma.hbm_to_vmem [thread:$0]  %s2235_s8, 3072, %s86_s7, [#allocation8], %s1965_s22, %s1965_s22, %s1966_s23  }
  0x52   :  { %s1895_s6 = scalar_lea.vmem %s110_s26, 2048  ;;  %p1900_p8 = scmp.lt.s32.totalorder %s110_s26, %s110_s26 }
  0x53   :  { %p1896_p7 = scmp.ne.s32.totalorder %s110_s26, %s1895_s6  ;;  %p1901_p9 = scmp.lt.s32.totalorder %s1895_s6, %s1895_s6 }
  0x55   :  { %p1902_p10 = por %p1901_p9, %p1900_p8 }
  0x57   :  { %p1903_p11 = pnand %p1902_p10, %p1896_p7 }
  0x59   :  { %1906 = shalt.err (!%p1903_p11)
}
  0x5a   :  { %115 = dma.hbm_to_vmem [thread:$0]  %s2237_s10, 2048, %s110_s26, [#allocation11], %s1961_s29, %s1961_s29, %s1962_s30  }
  0x5b   :  { %s1971_s5 = smov [#allocation15]   ;;  %s1972_s9 = smov [#allocation16]  }
  0x5c   :  { %s134_s19 = sshll.u32 %s1971_s5, 4  ;;  %s144_s18 = sshll.u32 %s1972_s9, 4  ;;  %s135_s19 = int_to_ptr.vmem [resolvable:$true] %s134_s19  ;;  %s145_s18 = int_to_ptr.vmem [resolvable:$true] %s144_s18 }
  0x5d   :  { %s1915_s8 = scalar_lea.vmem %s135_s19, 96  ;;  %p1920_p13 = scmp.lt.s32.totalorder %s135_s19, %s135_s19 }
  0x5e   :  { %p1916_p12 = scmp.ne.s32.totalorder %s135_s19, %s1915_s8  ;;  %p1921_p0 = scmp.lt.s32.totalorder %s1915_s8, %s1915_s8 }
  0x60   :  { %p1922_p1 = por %p1921_p0, %p1920_p13 }
  0x62   :  { %p1923_p2 = pnand %p1922_p1, %p1916_p12 }
  0x64   :  { %1926 = shalt.err (!%p1923_p2)
}
  0x65   :  { %137 = dma.hbm_to_vmem [thread:$0]  %s2240_s13, 96, %s135_s19, [#allocation14]  }
  0x66   :  { %s1935_s12 = scalar_lea.vmem %s145_s18, 16  ;;  %s1939_s10 = scalar_lea.vmem %s145_s18, 32 }
  0x67   :  { %p1936_p3 = scmp.ne.s32.totalorder %s145_s18, %s1935_s12  ;;  %p1940_p4 = scmp.lt.s32.totalorder %s145_s18, %s145_s18 }
  0x68   :  { %p1941_p5 = scmp.lt.s32.totalorder %s1939_s10, %s1935_s12 }
  0x6a   :  { %p1942_p6 = por %p1941_p5, %p1940_p4 }
  0x6c   :  { %p1943_p7 = pnand %p1942_p6, %p1936_p3 }
  0x6e   :  { %1946 = shalt.err (!%p1943_p7)
}
  0x6f   :  { %147 = dma.hbm_to_vmem [thread:$0]  %s2241_s14, 16, %s145_s18, [#allocation17]  }
  0x70   :  { %1947 = dma.done.wait [#allocation3], 128  }
  0x71   :  { %1948 = vsyncadd [#allocation3], 4294967168 }
  0x72   :  { %1949 = dma.done.wait [#allocation5], 96  }
  0x73   :  { %1950 = vsyncadd [#allocation5], 4294967200 }
  0x74   :  { %1951 = dma.done.wait [#allocation8], 4096  }
  0x75   :  { %1952 = vsyncadd [#allocation8], 4294963200 }
  0x76   :  { %1953 = dma.done.wait [#allocation11], 5120  }
  0x77   :  { %1954 = vsyncadd [#allocation11], 4294962176 }
  0x78   :  { %1955 = dma.done.wait [#allocation14], 160  }
  0x79   :  { %1956 = vsyncadd [#allocation14], 4294967136 }
  0x7a   :  { %1957 = dma.done.wait [#allocation17], 16  }
  0x7b   :  { %1958 = vsyncadd [#allocation17], 4294967280  ;;  %v1973_v0 = vmov 0.0   ;;  %vm1974_vm0 = vmmov 0   ;;  %vm200_vm1 = vcmask 1041408   ;;  %vm299_vm2 = vcmask 1043456  }
  0x7c   :  { %1485 = vmatprep.subr.bf16.mxu0 %v1973_v0  ;;  %1491 = vmatprep.subr.bf16.mxu1 %v1973_v0  ;;  %v195_v1 = vld [vmem:[#allocation4] sm:$0x3]  ;;  %v1640_v3 = vld [vmem:[#allocation2] sm:$0xff]   ;;  %s2245_s24 = sld [smem:[#allocation24_spill]]  ;;  %vm196_vm3 = vcmask 31744   ;;  %vm250_vm4 = vcmask 130048  }
  0x7d   :  { %1487 = vmatprep.mubr.msk.bf16.mxu0 %vm1974_vm0, %v1973_v0  ;;  %1493 = vmatprep.mubr.msk.bf16.mxu1 %vm1974_vm0, %v1973_v0  ;;  %v202_v2 = vsel %vm200_vm1, %v195_v1, 0  ;;  %v181_v4 = vld [vmem:[%s2228_s1] sm:$0xff]  ;;  %v294_v8 = vld [vmem:[#allocation6] sm:$0xf]  ;;  %v1643_v14 = vld [vmem:[#allocation7 + $0x28] sm:$0xff]   ;;  %vm295_vm5 = vcmask 64512  }
  0x7e   :  { %1486 = vmatpush3.bf16.msra.mxu0 %v202_v2  ;;  %v182_v6 = vpack.c.bf16 %v181_v4, %v181_v4  ;;  %1492 = vmatpush3.bf16.msra.mxu1 %v1640_v3  ;;  %v301_v9 = vsel %vm299_vm2, %v294_v8, 0  ;;  %v1641_v10 = vld [vmem:[#allocation7 + $0x38] sm:$0xff]   ;;  %v1642_v12 = vld [vmem:[#allocation7 + $0x30] sm:$0xff]   ;;  %v1644_v15 = vld [vmem:[#allocation7 + $0x20] sm:$0xff]   ;;  %v1975_v63 = vmov 0  }
  0x7f   :  { %1497 = vmatprep.subr.bf16.mxu0 %v1973_v0  ;;  %1503 = vmatprep.subr.bf16.mxu1 %v1973_v0  ;;  %v183_v11 = vld [vmem:[%s2229_s2] sm:$0xff]  ;;  %v1647_v18 = vld [vmem:[#allocation7 + $0x8] sm:$0xff]   ;;  %v1648_v19 = vld [vmem:[#allocation7] sm:$0xff]  }
  0x80   :  { %v184_v13 = vpack.c.bf16 %v183_v11, %v183_v11  ;;  %v1645_v16 = vld [vmem:[#allocation7 + $0x18] sm:$0xff]   ;;  %v1646_v17 = vld [vmem:[#allocation7 + $0x10] sm:$0xff]   ;;  %v1661_v27 = vld [vmem:[#allocation9 + $0x60] ss:$12 sps:$4 sm:$0xff]  }
  0x81   :  { %1488 = vmatmul.mubr.msk.bf16.vlgmr.msra.gmra.mxu0 %vm196_vm3, %v182_v6  ;;  %v1649_v20 = vld [vmem:[#allocation9 + $0xa8] ss:$12 sps:$4 sm:$0xff]   ;;  %v1651_v21 = vld [vmem:[#allocation9 + $0xac] ss:$12 sps:$4 sm:$0xff]   ;;  %v1653_v23 = vld [vmem:[#allocation9 + $0x90] ss:$12 sps:$4 sm:$0xff]  }
  0x82   :  { %v179_v5 = vld [vmem:[%s2245_s24] sm:$0xff]  ;;  %1498 = vmatpush3.bf16.msra.mxu0 %v301_v9  ;;  %1499 = vmatprep.mubr.msk.bf16.mxu0 %vm1974_vm0, %v1973_v0  ;;  %v1659_v24 = vld [vmem:[#allocation9 + $0x7c] ss:$12 sps:$4 sm:$0xff]   ;;  %v1341_v43 = vld [vmem:[#allocation13] ss:$0 sm:$0xff] }
  0x83   :  { %v180_v7 = vpack.c.bf16 %v179_v5, %v179_v5  ;;  %v1655_v22 = vld [vmem:[#allocation9 + $0x94] ss:$12 sps:$4 sm:$0xff]   ;;  %637 = vmatprep.subr.bf16.mxu0 %v1651_v21  ;;  %v1657_v25 = vld [vmem:[#allocation9 + $0x78] ss:$12 sps:$4 sm:$0xff]   ;;  %v1669_v31 = vld [vmem:[#allocation9 + $0x30] ss:$12 sps:$4 sm:$0xff]  }
  0x84   :  { %v1663_v26 = vld [vmem:[#allocation9 + $0x64] ss:$12 sps:$4 sm:$0xff]   ;;  %v1667_v28 = vld [vmem:[#allocation9 + $0x4c] ss:$12 sps:$4 sm:$0xff]   ;;  %v1665_v29 = vld [vmem:[#allocation9 + $0x48] ss:$12 sps:$4 sm:$0xff]  }
  0x85   :  { %1494 = vmatmul.mubr.msk.bf16.vlgmr.msra.gmra.mxu1 %vm250_vm4, %v180_v7  ;;  %v1671_v30 = vld [vmem:[#allocation9 + $0x34] ss:$12 sps:$4 sm:$0xff]   ;;  %v1675_v32 = vld [vmem:[#allocation9 + $0x1c] ss:$12 sps:$4 sm:$0xff]   ;;  %v1673_v33 = vld [vmem:[#allocation9 + $0x18] ss:$12 sps:$4 sm:$0xff]  }
  0x86   :  { %1504 = vmatpush3.bf16.msra.mxu1 %v1641_v10  ;;  %1519 = vmatprep.mubr.msk.bf16.mxu1 %vm1974_vm0, %v1973_v0  ;;  %v1652_v51 = vld [vmem:[#allocation9 + $0xb0] ss:$12 sps:$4 sm:$0xff]   ;;  %v1656_v53 = vld [vmem:[#allocation9 + $0x98] ss:$12 sps:$4 sm:$0xff]   ;;  %v1660_v54 = vld [vmem:[#allocation9 + $0x80] ss:$12 sps:$4 sm:$0xff]  }
  0x87   :  { %1505 = vmatprep.subr.bf16.mxu1 %v1973_v0  ;;  %v1664_v55 = vld [vmem:[#allocation9 + $0x68] ss:$12 sps:$4 sm:$0xff]   ;;  %v1668_v56 = vld [vmem:[#allocation9 + $0x50] ss:$12 sps:$4 sm:$0xff]   ;;  %v1672_v57 = vld [vmem:[#allocation9 + $0x38] ss:$12 sps:$4 sm:$0xff]  }
  0x88   :  { %v1676_v58 = vld [vmem:[#allocation9 + $0x20] ss:$12 sps:$4 sm:$0xff]   ;;  %v1679_v59 = vld [vmem:[#allocation9 + $0x4] ss:$12 sps:$4 sm:$0xff]   ;;  %v1680_v61 = vld [vmem:[#allocation9 + $0x8] ss:$12 sps:$4 sm:$0xff]  }
  0x89   :  { %1500 = vmatmul.mubr.msk.bf16.vlgmr.msra.gmra.mxu0 %vm295_vm5, %v184_v13  ;;  %v1677_v60 = vld [vmem:[#allocation9] ss:$12 sps:$4 sm:$0xff]   ;;  %v1681_v7 = vld [vmem:[#allocation10 + $0xa8] ss:$12 sps:$4 sm:$0xff]   ;;  %v1684_v8 = vld [vmem:[#allocation10 + $0xb0] ss:$12 sps:$4 sm:$0xff]  }
  0x8a   :  { %1506 = vmatpush3.bf16.msra.mxu1 %v1642_v12  ;;  %638 = vmatpush1.bf16.msra.mxu0 %v1649_v20  ;;  %v1683_v62 = vld [vmem:[#allocation10 + $0xac] ss:$12 sps:$4 sm:$0xff]   ;;  %v1342_v1 = vld [vmem:[#allocation13 + $0x1] ss:$0 sm:$0xff]  ;;  %v1685_v12 = vld [vmem:[#allocation10 + $0x90] ss:$12 sps:$4 sm:$0xff]  }
  0x8b   :  { %1507 = vmatprep.subr.bf16.mxu1 %v1973_v0  ;;  %639 = vmatprep.subr.bf16.mxu0 %v1655_v22  ;;  %v1687_v10 = vld [vmem:[#allocation10 + $0x94] ss:$12 sps:$4 sm:$0xff]   ;;  %v1688_v13 = vld [vmem:[#allocation10 + $0x98] ss:$12 sps:$4 sm:$0xff]   ;;  %v1700_v22 = vld [vmem:[#allocation10 + $0x50] ss:$12 sps:$4 sm:$0xff]  }
  0x8c   :  { %669 = vmatprep.mubr.bf16.mxu0 %v1975_v63  ;;  %v1699_v20 = vld [vmem:[#allocation10 + $0x4c] ss:$12 sps:$4 sm:$0xff]   ;;  %v1697_v21 = vld [vmem:[#allocation10 + $0x48] ss:$12 sps:$4 sm:$0xff]  }
  0x8e   :  { %1508 = vmatpush3.bf16.msra.mxu1 %v1643_v14  ;;  %640 = vmatpush1.bf16.msra.mxu0 %v1653_v23  ;;  %v1691_v14 = vld [vmem:[#allocation10 + $0x7c] ss:$12 sps:$4 sm:$0xff]   ;;  %v1703_v23 = vld [vmem:[#allocation10 + $0x34] ss:$12 sps:$4 sm:$0xff]  }
  0x8f   :  { %1509 = vmatprep.subr.bf16.mxu1 %v1973_v0  ;;  %641 = vmatprep.subr.bf16.mxu0 %v1659_v24  ;;  %v1701_v24 = vld [vmem:[#allocation10 + $0x30] ss:$12 sps:$4 sm:$0xff]  }
  0x92   :  { %1510 = vmatpush3.bf16.msra.mxu1 %v1644_v15  ;;  %642 = vmatpush1.bf16.msra.mxu0 %v1657_v25  ;;  %v1689_v15 = vld [vmem:[#allocation10 + $0x78] ss:$12 sps:$4 sm:$0xff]  }
  0x93   :  { %1511 = vmatprep.subr.bf16.mxu1 %v1973_v0  ;;  %643 = vmatprep.subr.bf16.mxu0 %v1663_v26  ;;  %v1704_v25 = vld [vmem:[#allocation10 + $0x38] ss:$12 sps:$4 sm:$0xff]   ;;  %v1707_v26 = vld [vmem:[#allocation10 + $0x1c] ss:$12 sps:$4 sm:$0xff]  }
  0x96   :  { %1512 = vmatpush3.bf16.msra.mxu1 %v1645_v16  ;;  %644 = vmatpush1.bf16.msra.mxu0 %v1661_v27  ;;  %v1692_v16 = vld [vmem:[#allocation10 + $0x80] ss:$12 sps:$4 sm:$0xff]   ;;  %v1705_v27 = vld [vmem:[#allocation10 + $0x18] ss:$12 sps:$4 sm:$0xff]  }
  0x97   :  { %1513 = vmatprep.subr.bf16.mxu1 %v1973_v0  ;;  %645 = vmatprep.subr.bf16.mxu0 %v1667_v28  ;;  %v1708_v28 = vld [vmem:[#allocation10 + $0x20] ss:$12 sps:$4 sm:$0xff]  }
  0x9a   :  { %1514 = vmatpush3.bf16.msra.mxu1 %v1646_v17  ;;  %646 = vmatpush1.bf16.msra.mxu0 %v1665_v29  ;;  %v1695_v17 = vld [vmem:[#allocation10 + $0x64] ss:$12 sps:$4 sm:$0xff]  }
  0x9b   :  { %1515 = vmatprep.subr.bf16.mxu1 %v1973_v0  ;;  %647 = vmatprep.subr.bf16.mxu0 %v1671_v30  ;;  %v1711_v29 = vld [vmem:[#allocation10 + $0x4] ss:$12 sps:$4 sm:$0xff]   ;;  %v1709_v30 = vld [vmem:[#allocation10] ss:$12 sps:$4 sm:$0xff]  }
  0x9e   :  { %1516 = vmatpush3.bf16.msra.mxu1 %v1647_v18  ;;  %648 = vmatpush1.bf16.msra.mxu0 %v1669_v31  ;;  %v1693_v18 = vld [vmem:[#allocation10 + $0x60] ss:$12 sps:$4 sm:$0xff]   ;;  %v1712_v31 = vld [vmem:[#allocation10 + $0x8] ss:$12 sps:$4 sm:$0xff]  }
  0x9f   :  { %1517 = vmatprep.subr.bf16.mxu1 %v1973_v0  ;;  %649 = vmatprep.subr.bf16.mxu0 %v1675_v32  ;;  %v2160_v32 = vld [vmem:[%s2230_s3] sm:$0xff] }
  0xa2   :  { %1518 = vmatpush3.bf16.msra.mxu1 %v1648_v19  ;;  %650 = vmatpush1.bf16.msra.mxu0 %v1673_v33  ;;  %v1696_v19 = vld [vmem:[#allocation10 + $0x68] ss:$12 sps:$4 sm:$0xff]   ;;  %v186_v33 = vpack.c.bf16 %v2160_v32, %v2160_v32 }
  0xa3   :  { %1523 = vmatprep.subr.bf16.mxu1 %v1973_v0  ;;  %651 = vmatprep.subr.bf16.mxu0 %v1679_v59 }
  0xa6   :  { %652 = vmatpush1.bf16.msra.mxu0 %v1677_v60 }
  0xa7   :  { %894 = vmatprep.subr.bf16.mxu0 %v1683_v62  ;;  %v192_v62 = vld [vmem:[#allocation15 + $0x1] ss:$2 sm:$0x7] }
 0x141   :  { %v238_v34 = vpop.f32.mrf.mxu0 }
 0x143   :  { %v1489_v36 = vpop.f32.mrf.mxu0 }
 0x144   :  { %v1715_v36 = vld [vmem:[#allocation12 + $0x28] sm:$0xff]  }
 0x145   :  { %v288_v35 = vpop.f32.mrf.mxu1  ;;  %v241_v38 = vpop.f32.mrf.mxu0 }
 0x146   :  { %v289_v41 = vadd.f32 %v288_v35, %v238_v34  ;;  %v1713_v34 = vld [vmem:[#allocation12 + $0x38] sm:$0xff]   ;;  %v1714_v35 = vld [vmem:[#allocation12 + $0x30] sm:$0xff]  }
 0x147   :  { %v1495_v37 = vpop.f32.mrf.mxu1  ;;  %v1490_v40 = vpop.f32.mrf.mxu0  ;;  %v1717_v38 = vld [vmem:[#allocation12 + $0x18] sm:$0xff]  }
 0x148   :  { %v1716_v37 = vld [vmem:[#allocation12 + $0x20] sm:$0xff]   ;;  %v1719_v40 = vld [vmem:[#allocation12 + $0x8] sm:$0xff]  }
 0x149   :  { %v291_v39 = vpop.f32.mrf.mxu1  ;;  %v337_v44 = vpop.f32.mrf.mxu0 }
 0x14a   :  { %v343_v45 = vadd.f32 %v337_v44, %v289_v41  ;;  %v1718_v39 = vld [vmem:[#allocation12 + $0x10] sm:$0xff]   ;;  %v1720_v41 = vld [vmem:[#allocation12] sm:$0xff]   ;;  %v1723_v44 = vld [vmem:[#allocation12 + $0x68] sm:$0xff]  }
 0x14b   :  { %v1496_v42 = vpop.f32.mrf.mxu1  ;;  %v1501_v46 = vpop.f32.mrf.mxu0 }
 0x14c   :  { %v348_v47 = vadd.f32 %v1341_v43, %v343_v45  ;;  %v1721_v42 = vld [vmem:[#allocation12 + $0x78] sm:$0xff]   ;;  %v1722_v43 = vld [vmem:[#allocation12 + $0x70] sm:$0xff]   ;;  %v1724_v45 = vld [vmem:[#allocation12 + $0x60] sm:$0xff]  }
 0x14d   :  { %v340_v48 = vpop.f32.mrf.mxu0  ;;  %v1725_v46 = vld [vmem:[#allocation12 + $0x58] sm:$0xff]  }
 0x14e   :  { %v349_v49 = vmax.f32 %v348_v47, 0.0  ;;  %v1726_v47 = vld [vmem:[#allocation12 + $0x50] sm:$0xff]   ;;  %v1727_v48 = vld [vmem:[#allocation12 + $0x48] sm:$0xff]  }
 0x14f   :  { %v1502_v50 = vpop.f32.mrf.mxu0 }
 0x150   :  { %v350_v52 = vpack.c.bf16 %v349_v49, %v349_v49  ;;  %v1728_v49 = vld [vmem:[#allocation12 + $0x40] sm:$0xff]  }
 0x152   :  { %1520 = vmatmul.mubr.bf16.vlgmr.msra.gmra.mxu1 %v350_v52 }
 0x153   :  { %1524 = vmatpush3.bf16.msra.mxu1 %v1652_v51  ;;  %1539 = vmatprep.mubr.msk.bf16.mxu1 %vm1974_vm0, %v1973_v0 }
 0x154   :  { %1525 = vmatprep.subr.bf16.mxu1 %v1973_v0 }
 0x157   :  { %1526 = vmatpush3.bf16.msra.mxu1 %v1656_v53 }
 0x158   :  { %1527 = vmatprep.subr.bf16.mxu1 %v1973_v0 }
 0x15b   :  { %1528 = vmatpush3.bf16.msra.mxu1 %v1660_v54 }
 0x15c   :  { %1529 = vmatprep.subr.bf16.mxu1 %v1973_v0 }
 0x15f   :  { %1530 = vmatpush3.bf16.msra.mxu1 %v1664_v55 }
 0x160   :  { %1531 = vmatprep.subr.bf16.mxu1 %v1973_v0 }
 0x163   :  { %1532 = vmatpush3.bf16.msra.mxu1 %v1668_v56 }
 0x164   :  { %1533 = vmatprep.subr.bf16.mxu1 %v1973_v0 }
 0x167   :  { %1534 = vmatpush3.bf16.msra.mxu1 %v1672_v57 }
 0x168   :  { %1535 = vmatprep.subr.bf16.mxu1 %v1973_v0 }
 0x16b   :  { %1536 = vmatpush3.bf16.msra.mxu1 %v1676_v58  ;;  %v494_v58 = vlaneseq }
 0x16c   :  { %1537 = vmatprep.subr.bf16.mxu1 %v1973_v0 }
 0x16d   :  { %v495_v59 = vshrl.u32 %v494_v58, 7 }
 0x16f   :  { %1538 = vmatpush3.bf16.msra.mxu1 %v1680_v61  ;;  %v496_v60 = vsub.s32 0, %v495_v59  ;;  %v190_v61 = vld [vmem:[#allocation15] ss:$2 sm:$0x7] }
 0x170   :  { %1543 = vmatprep.subr.bf16.mxu1 %v1973_v0 }
 0x212   :  { %v453_v2 = vpop.f32.mrf.mxu1 }
 0x213   :  { %v454_v3 = vadd.f32 %v1342_v1, %v453_v2  ;;  %v500_v1 = vsub.s32 1, %v495_v59  ;;  %v754_v2 = vrot.slane %v192_v62, %v496_v60 }
 0x214   :  { %v1521_v4 = vpop.f32.mrf.mxu1 }
 0x215   :  { %v459_v5 = vmax.f32 %v454_v3, 0.0  ;;  %v758_v3 = vrot.slane %v192_v62, %v500_v1 }
 0x216   :  { %v456_v6 = vpop.f32.mrf.mxu1 }
 0x217   :  { %v2145_v9 = vpack.c.bf16 %v459_v5, %v459_v5 }
 0x218   :  { %v1522_v11 = vpop.f32.mrf.mxu1 }
 0x219   :  { %670 = vmatmul.mubr.bf16.vlgmr.msra.gmra.mxu0 %v2145_v9  ;;  %1540 = vmatmul.mubr.bf16.vlgmr.msra.gmra.mxu1 %v2145_v9 }
 0x21a   :  { %895 = vmatpush1.bf16.msra.mxu0 %v1681_v7  ;;  %1544 = vmatpush3.bf16.msra.mxu1 %v1684_v8  ;;  %v501_v7 = vrot.slane %v190_v61, %v500_v1 }
 0x21b   :  { %896 = vmatprep.subr.bf16.mxu0 %v1687_v10  ;;  %1545 = vmatprep.subr.bf16.mxu1 %v1973_v0 }
 0x21c   :  { %926 = vmatprep.mubr.bf16.mxu0 %v1975_v63  ;;  %1559 = vmatprep.mubr.msk.bf16.mxu1 %vm1974_vm0, %v1973_v0  ;;  %v497_v63 = vrot.slane %v190_v61, %v496_v60 }
 0x21e   :  { %897 = vmatpush1.bf16.msra.mxu0 %v1685_v12  ;;  %1546 = vmatpush3.bf16.msra.mxu1 %v1688_v13 }
 0x21f   :  { %898 = vmatprep.subr.bf16.mxu0 %v1691_v14  ;;  %1547 = vmatprep.subr.bf16.mxu1 %v1973_v0 }
 0x222   :  { %899 = vmatpush1.bf16.msra.mxu0 %v1689_v15  ;;  %1548 = vmatpush3.bf16.msra.mxu1 %v1692_v16 }
 0x223   :  { %900 = vmatprep.subr.bf16.mxu0 %v1695_v17  ;;  %1549 = vmatprep.subr.bf16.mxu1 %v1973_v0 }
 0x226   :  { %901 = vmatpush1.bf16.msra.mxu0 %v1693_v18  ;;  %1550 = vmatpush3.bf16.msra.mxu1 %v1696_v19 }
 0x227   :  { %902 = vmatprep.subr.bf16.mxu0 %v1699_v20  ;;  %1551 = vmatprep.subr.bf16.mxu1 %v1973_v0 }
 0x22a   :  { %903 = vmatpush1.bf16.msra.mxu0 %v1697_v21  ;;  %1552 = vmatpush3.bf16.msra.mxu1 %v1700_v22 }
 0x22b   :  { %904 = vmatprep.subr.bf16.mxu0 %v1703_v23  ;;  %1553 = vmatprep.subr.bf16.mxu1 %v1973_v0 }
 0x22e   :  { %905 = vmatpush1.bf16.msra.mxu0 %v1701_v24  ;;  %1554 = vmatpush3.bf16.msra.mxu1 %v1704_v25  ;;  %v504_v25 = vsub.s32 2, %v495_v59 }
 0x22f   :  { %906 = vmatprep.subr.bf16.mxu0 %v1707_v26  ;;  %1555 = vmatprep.subr.bf16.mxu1 %v1973_v0 }
 0x230   :  { %v762_v26 = vrot.slane %v192_v62, %v504_v25 }
 0x232   :  { %907 = vmatpush1.bf16.msra.mxu0 %v1705_v27  ;;  %1556 = vmatpush3.bf16.msra.mxu1 %v1708_v28 }
 0x233   :  { %908 = vmatprep.subr.bf16.mxu0 %v1711_v29  ;;  %1557 = vmatprep.subr.bf16.mxu1 %v1973_v0 }
 0x236   :  { %909 = vmatpush1.bf16.msra.mxu0 %v1709_v30  ;;  %1558 = vmatpush3.bf16.msra.mxu1 %v1712_v31  ;;  %v505_v30 = vrot.slane %v190_v61, %v504_v25 }
 0x237   :  { %1583 = vmatprep.subr.bf16.mxu1 %v1973_v0  ;;  %1563 = vmatprep.subr.bf16.mxu0 %v1973_v0 }
 0x239   :  { %927 = vmatmul.mubr.bf16.vlgmr.msra.gmra.mxu0 %v186_v33  ;;  %1560 = vmatmul.mubr.bf16.vlgmr.msra.gmra.mxu1 %v186_v33 }
 0x23a   :  { %1584 = vmatpush3.bf16.msra.mxu1 %v1713_v34  ;;  %1599 = vmatprep.mubr.msk.bf16.mxu1 %vm1974_vm0, %v1973_v0 }
 0x23b   :  { %1585 = vmatprep.subr.bf16.mxu1 %v1973_v0  ;;  %1579 = vmatprep.mubr.msk.bf16.mxu0 %vm1974_vm0, %v1973_v0 }
 0x23c   :  { %1564 = vmatpush3.bf16.msra.mxu0 %v1721_v42 }
 0x23d   :  { %1565 = vmatprep.subr.bf16.mxu0 %v1973_v0 }
 0x23e   :  { %1586 = vmatpush3.bf16.msra.mxu1 %v1714_v35 }
 0x23f   :  { %1587 = vmatprep.subr.bf16.mxu1 %v1973_v0 }
 0x240   :  { %1566 = vmatpush3.bf16.msra.mxu0 %v1722_v43 }
 0x241   :  { %1567 = vmatprep.subr.bf16.mxu0 %v1973_v0 }
 0x242   :  { %1588 = vmatpush3.bf16.msra.mxu1 %v1715_v36 }
 0x243   :  { %1589 = vmatprep.subr.bf16.mxu1 %v1973_v0 }
 0x244   :  { %1568 = vmatpush3.bf16.msra.mxu0 %v1723_v44 }
 0x245   :  { %1569 = vmatprep.subr.bf16.mxu0 %v1973_v0 }
 0x246   :  { %1590 = vmatpush3.bf16.msra.mxu1 %v1716_v37 }
 0x247   :  { %1591 = vmatprep.subr.bf16.mxu1 %v1973_v0 }
 0x248   :  { %1570 = vmatpush3.bf16.msra.mxu0 %v1724_v45 }
 0x249   :  { %1571 = vmatprep.subr.bf16.mxu0 %v1973_v0 }
 0x24a   :  { %1592 = vmatpush3.bf16.msra.mxu1 %v1717_v38 }
 0x24b   :  { %1593 = vmatprep.subr.bf16.mxu1 %v1973_v0 }
 0x24c   :  { %1572 = vmatpush3.bf16.msra.mxu0 %v1725_v46  ;;  %v1729_v46 = vld [vmem:[%s2238_s11 + $0x38] sm:$0xff]  }
 0x24d   :  { %1573 = vmatprep.subr.bf16.mxu0 %v1973_v0 }
 0x24e   :  { %1594 = vmatpush3.bf16.msra.mxu1 %v1718_v39 }
 0x24f   :  { %1595 = vmatprep.subr.bf16.mxu1 %v1973_v0 }
 0x250   :  { %1574 = vmatpush3.bf16.msra.mxu0 %v1726_v47 }
 0x251   :  { %1575 = vmatprep.subr.bf16.mxu0 %v1973_v0 }
 0x252   :  { %1596 = vmatpush3.bf16.msra.mxu1 %v1719_v40 }
 0x253   :  { %1597 = vmatprep.subr.bf16.mxu1 %v1973_v0 }
 0x254   :  { %1576 = vmatpush3.bf16.msra.mxu0 %v1727_v48  ;;  %v1730_v48 = vld [vmem:[%s2238_s11 + $0x30] sm:$0xff]  }
 0x255   :  { %1577 = vmatprep.subr.bf16.mxu0 %v1973_v0 }
 0x256   :  { %1598 = vmatpush3.bf16.msra.mxu1 %v1720_v41 }
 0x258   :  { %1578 = vmatpush3.bf16.msra.mxu0 %v1728_v49  ;;  %v1732_v49 = vld [vmem:[%s2238_s11 + $0x20] sm:$0xff]  }
 0x259   :  { %1600 = vmatmul.mubr.bf16.vlgmr.msra.gmra.mxu1 %v2145_v9  ;;  %1603 = vmatprep.subr.bf16.mxu0 %v1973_v0 }
 0x2d9   :  { %v671_v50 = vpop.f32.mrf.mxu0  ;;  %v712_v51 = vpop.f32.mrf.mxu1 }
 0x2da   :  { %v672_v6 = vadd.f32 %v671_v50, %v497_v63  ;;  %v713_v37 = vadd.f32 %v712_v51, %v505_v30  ;;  %v1733_v50 = vld [vmem:[%s2238_s11 + $0x18] sm:$0xff]   ;;  %v1734_v51 = vld [vmem:[%s2238_s11 + $0x10] sm:$0xff]  }
 0x2db   :  { %v673_v52 = vpop.f32.mrf.mxu0  ;;  %v1541_v53 = vpop.f32.mrf.mxu1  ;;  %v1416_v63 = vld [vmem:[#allocation16] ss:$0 sm:$0xff] }
 0x2dc   :  { %v674_v15 = vadd.f32 %v673_v52, %v501_v7  ;;  %v1735_v52 = vld [vmem:[%s2238_s11 + $0x8] sm:$0xff]   ;;  %v1736_v53 = vld [vmem:[%s2238_s11] sm:$0xff]  }
 0x2dd   :  { %v675_v54 = vpop.f32.mrf.mxu0  ;;  %v715_v55 = vpop.f32.mrf.mxu1 }
 0x2de   :  { %v1415_v54 = vld [vmem:[#allocation13 + $0x2] ss:$0 sm:$0xff] }
 0x2df   :  { %v676_v56 = vpop.f32.mrf.mxu0  ;;  %v1542_v57 = vpop.f32.mrf.mxu1 }
 0x2f9   :  { %v928_v4 = vpop.f32.mrf.mxu0  ;;  %v969_v5 = vpop.f32.mrf.mxu1 }
 0x2fa   :  { %v929_v8 = vadd.f32 %v928_v4, %v754_v2  ;;  %v970_v33 = vadd.f32 %v969_v5, %v762_v26 }
 0x2fb   :  { %v930_v9 = vpop.f32.mrf.mxu0  ;;  %v1561_v10 = vpop.f32.mrf.mxu1 }
 0x2fc   :  { %v975_v11 = vadd.f32 %v929_v8, %v672_v6  ;;  %v931_v12 = vadd.f32 %v930_v9, %v758_v3 }
 0x2fd   :  { %v932_v13 = vpop.f32.mrf.mxu0  ;;  %v972_v14 = vpop.f32.mrf.mxu1 }
 0x2fe   :  { %v976_v16 = vsub.f32 0.0, %v975_v11  ;;  %v981_v20 = vadd.f32 %v931_v12, %v674_v15 }
 0x2ff   :  { %v933_v17 = vpop.f32.mrf.mxu0  ;;  %v1562_v18 = vpop.f32.mrf.mxu1 }
 0x300   :  { %v977_v19 = vmul.f32 1.442695, %v976_v16  ;;  %v982_v21 = vsub.f32 0.0, %v981_v20 }
 0x302   :  { %1737 = vpow2.f32 %v977_v19  ;;  %v983_v22 = vmul.f32 1.442695, %v982_v21 }
 0x304   :  { %1739 = vpow2.f32 %v983_v22 }
 0x30f   :  { %v1738_v23 = vpop.eup %1737 }
 0x310   :  { %v979_v24 = vadd.f32 1.0, %v1738_v23 }
 0x311   :  { %v1740_v27 = vpop.eup %1739 }
 0x312   :  { %1741 = vrcp.f32 %v979_v24  ;;  %v985_v31 = vadd.f32 1.0, %v1740_v27 }
 0x314   :  { %1743 = vrcp.f32 %v985_v31 }
 0x319   :  { %v1197_v28 = vpop.f32.mrf.mxu1 }
 0x31b   :  { %v1601_v29 = vpop.f32.mrf.mxu1 }
 0x31d   :  { %v1200_v34 = vpop.f32.mrf.mxu1 }
 0x31f   :  { %v1742_v35 = vpop.eup %1741  ;;  %v1602_v36 = vpop.f32.mrf.mxu1 }
 0x320   :  { %v987_v38 = vmul.f32 %v1742_v35, %v970_v33 }
 0x321   :  { %v1744_v40 = vpop.eup %1743 }
 0x322   :  { %v988_v39 = vadd.f32 %v987_v38, %v713_v37  ;;  %v990_v41 = vsub.f32 1.0, %v1744_v40  ;;  %v992_v44 = vmul.f32 %v1744_v40, %v2160_v32  ;;  %v1731_v32 = vld [vmem:[%s2238_s11 + $0x28] sm:$0xff]  }
 0x324   :  { %1745 = vtanh.f32 %v988_v39 }
 0x331   :  { %v1746_v42 = vpop.eup %1745 }
 0x332   :  { %v991_v43 = vmul.f32 %v1746_v42, %v990_v41 }
 0x334   :  { %v993_v45 = vadd.f32 %v992_v44, %v991_v43 }
 0x336   :  { %v1010_v47 = vpack.c.bf16 %v993_v45, %v993_v45  ;;  %1322 = vst [vmem:[%s2243_s16] sm:$0xff] %v993_v45 }
 0x338   :  { %1580 = vmatmul.mubr.bf16.vlgmr.msra.gmra.mxu0 %v1010_v47 }
 0x339   :  { %1604 = vmatpush3.bf16.msra.mxu0 %v1729_v46  ;;  %1619 = vmatprep.mubr.msk.bf16.mxu0 %vm1974_vm0, %v1973_v0 }
 0x33a   :  { %1605 = vmatprep.subr.bf16.mxu0 %v1973_v0 }
 0x33d   :  { %1606 = vmatpush3.bf16.msra.mxu0 %v1730_v48 }
 0x33e   :  { %1607 = vmatprep.subr.bf16.mxu0 %v1973_v0 }
 0x341   :  { %1608 = vmatpush3.bf16.msra.mxu0 %v1731_v32 }
 0x342   :  { %1609 = vmatprep.subr.bf16.mxu0 %v1973_v0 }
 0x345   :  { %1610 = vmatpush3.bf16.msra.mxu0 %v1732_v49 }
 0x346   :  { %1611 = vmatprep.subr.bf16.mxu0 %v1973_v0 }
 0x349   :  { %1612 = vmatpush3.bf16.msra.mxu0 %v1733_v50 }
 0x34a   :  { %1613 = vmatprep.subr.bf16.mxu0 %v1973_v0 }
 0x34d   :  { %1614 = vmatpush3.bf16.msra.mxu0 %v1734_v51 }
 0x34e   :  { %1615 = vmatprep.subr.bf16.mxu0 %v1973_v0 }
 0x351   :  { %1616 = vmatpush3.bf16.msra.mxu0 %v1735_v52 }
 0x352   :  { %1617 = vmatprep.subr.bf16.mxu0 %v1973_v0 }
 0x355   :  { %1618 = vmatpush3.bf16.msra.mxu0 %v1736_v53 }
 0x3f8   :  { %v1109_v55 = vpop.f32.mrf.mxu0 }
 0x3f9   :  { %v1198_v56 = vadd.f32 %v1197_v28, %v1109_v55 }
 0x3fa   :  { %v1581_v57 = vpop.f32.mrf.mxu0 }
 0x3fb   :  { %v1207_v58 = vadd.f32 %v1415_v54, %v1198_v56 }
 0x3fc   :  { %v1112_v59 = vpop.f32.mrf.mxu0 }
 0x3fd   :  { %v1208_v60 = vmax.f32 %v1207_v58, 0.0 }
 0x3fe   :  { %v1582_v61 = vpop.f32.mrf.mxu0 }
 0x3ff   :  { %v1209_v62 = vpack.c.bf16 %v1208_v60, %v1208_v60 }
 0x401   :  { %1620 = vmatmul.mubr.bf16.vlgmr.msra.gmra.mxu0 %v1209_v62 }
 0x4c1   :  { %v1315_v1 = vpop.f32.mrf.mxu0 }
 0x4c2   :  { %v1316_v2 = vadd.f32 %v1416_v63, %v1315_v1 }
 0x4c3   :  { %v1621_v3 = vpop.f32.mrf.mxu0 }
 0x4c4   :  { %1321 = vst [vmem:[%s2242_s15] sm:$0xff] %v1316_v2 }
 0x4c5   :  { %v1318_v0 = vpop.f32.mrf.mxu0 }
 0x4c7   :  { %v1622_v4 = vpop.f32.mrf.mxu0 }
 0x4c8   :  { %1331 = vsyncpa [#allocation3], 1 }
 0x4c9   :  { %1332 = vsyncpa [#allocation5], 1 }
 0x4ca   :  { %1333 = vsyncpa [#allocation8], 1 }
 0x4cb   :  { %1334 = vsyncpa [#allocation11], 1 }
 0x4cc   :  { %1335 = vsyncpa [#allocation14], 1 }
 0x4cd   :  { %1336 = vsyncpa [#allocation17], 1 }

</bundles_post_ra>
